<compile_context>
chip_gen: v5e
topology: v5e:2x2
jax: 0.10.0
libtpu: 0.0.40
codegen_flags: <defaults>
</compile_context>

<pallas_src>
import functools

import jax
import jax.numpy as jnp
from jax.experimental import pallas as pl
from jax.experimental.pallas import tpu as pltpu

_LANE = 128      # vreg lane width (last dim)
_SUBLANE = 8     # vreg sublane count (second-to-last dim, f32 refs)


def _round_up(x, m):
    return ((x + m - 1) // m) * m


def _vmem_capacity_bytes():
    """Physical per-core VMEM; conservative (v7x) default if query fails."""
    try:
        return int(pltpu.get_tpu_info().vmem_capacity_bytes)
    except Exception:
        return 64 << 20


# ---------------------------------------------------------------------------
# Fused path: whole MLP in one pallas_call, weights resident in VMEM.
# ---------------------------------------------------------------------------
def _fused_mlp_kernel(*refs, num_layers):
    """refs = (x_ref, w0, b0, ..., w_{L-1}, b_{L-1}, o_ref).

    Weights are bf16 (MXU-native); activations live in f32 and are cast to
    bf16 only as dot operands, so accumulation / bias / ReLU stay f32.
    """
    x_ref = refs[0]
    o_ref = refs[-1]
    wb = refs[1:-1]

    h = x_ref[...]                                         # (TM, K_in) f32
    for i in range(num_layers):
        w = wb[2 * i][...]                                 # (K_i, N_i) bf16, resident
        b = wb[2 * i + 1][...]                             # (1,  N_i) f32,  resident
        h = jnp.dot(h.astype(jnp.bfloat16), w,
                    preferred_element_type=jnp.float32) + b
        if i < num_layers - 1:
            h = jnp.maximum(h, 0.0)                        # ReLU (f32 on VPU)
    o_ref[...] = h.astype(o_ref.dtype)                     # single store


def _fused_resident_mlp(x, padded_params, *, TM, vmem_limit):
    M, K = x.shape
    num_layers = len(padded_params)
    n_last = padded_params[-1][0].shape[1]

    M_pad = _round_up(M, TM)
    if M_pad != M:
        x = jnp.pad(x, ((0, M_pad - M), (0, 0)))
    grid = (M_pad // TM,)

    # x / out are tiled over rows; weights & biases use constant index_maps
    # so they are fetched once and stay resident across all row tiles.
    # TODO(synk): add pipeline_mode=pl.Buffered(3) on the x spec if a trace
    # shows the x DMA exposed for large K (costs one extra TM x K buffer).
    in_specs = [pl.BlockSpec((TM, K), lambda i: (i, 0))]
    flat_args = [x]
    for (w, b) in padded_params:
        in_specs.append(pl.BlockSpec(w.shape, lambda i: (0, 0)))
        in_specs.append(pl.BlockSpec(b.shape, lambda i: (0, 0)))
        flat_args.extend((w, b))
    out_spec = pl.BlockSpec((TM, n_last), lambda i: (i, 0))

    out = pl.pallas_call(
        functools.partial(_fused_mlp_kernel, num_layers=num_layers),
        out_shape=jax.ShapeDtypeStruct((M_pad, n_last), jnp.float32),
        grid=grid,
        in_specs=in_specs,
        out_specs=out_spec,
        compiler_params=pltpu.CompilerParams(
            dimension_semantics=("parallel",),        # row tiles -> both TCs
            vmem_limit_bytes=int(vmem_limit),
        ),
    )(*flat_args)
    return out[:M]


# ---------------------------------------------------------------------------
# Fallback path: per-layer streamed tiled matmul (weights do NOT fit VMEM).
# ---------------------------------------------------------------------------
def _linear_kernel(x_ref, w_ref, b_ref, o_ref, acc_ref, *, relu):
    k = pl.program_id(2)

    @pl.when(k == 0)
    def _():
        acc_ref[...] = jnp.zeros_like(acc_ref)

    acc_ref[...] += jnp.dot(x_ref[...].astype(jnp.bfloat16), w_ref[...],
                            preferred_element_type=jnp.float32)

    @pl.when(k == pl.num_programs(2) - 1)
    def _():
        y = acc_ref[...] + b_ref[...]
        if relu:
            y = jnp.maximum(y, 0.0)
        o_ref[...] = y.astype(o_ref.dtype)


def _streamed_linear(x, w, b, *, relu, tm=256, tn=256, tk=512):
    """y = relu?(x @ w + b) with w streamed tile-by-tile (v7x big-MLP path)."""
    M, K = x.shape
    _, N = w.shape
    tm = min(tm, _round_up(M, _SUBLANE))
    tk = min(tk, _round_up(K, _LANE))
    tn = min(tn, _round_up(N, _LANE))
    Mp, Kp, Np = _round_up(M, tm), _round_up(K, tk), _round_up(N, tn)

    xp = jnp.pad(x, ((0, Mp - M), (0, Kp - K))) if (Mp, Kp) != (M, K) else x
    wp = jnp.pad(w, ((0, Kp - K), (0, Np - N))) if (Kp, Np) != (K, N) else w
    bp = jnp.pad(b, ((0, 0), (0, Np - N))) if Np != N else b

    grid = (Mp // tm, Np // tn, Kp // tk)
    out = pl.pallas_call(
        functools.partial(_linear_kernel, relu=relu),
        out_shape=jax.ShapeDtypeStruct((Mp, Np), jnp.float32),
        grid=grid,
        in_specs=[pl.BlockSpec((tm, tk), lambda i, j, k: (i, k)),
                  pl.BlockSpec((tk, tn), lambda i, j, k: (k, j)),
                  pl.BlockSpec((1, tn), lambda i, j, k: (0, j))],
        out_specs=pl.BlockSpec((tm, tn), lambda i, j, k: (i, j)),
        scratch_shapes=[pltpu.VMEM((tm, tn), jnp.float32)],
        compiler_params=pltpu.CompilerParams(
            dimension_semantics=("parallel", "parallel", "arbitrary")),
    )(xp, wp, bp)
    return out[:M, :N]


# ---------------------------------------------------------------------------
# Dispatcher: pick fused-resident vs streamed based on real VMEM capacity.
# ---------------------------------------------------------------------------
def mlp_forward(x, padded_params, *, min_tiles=2):
    M, K = x.shape
    num_layers = len(padded_params)
    n_last = padded_params[-1][0].shape[1]

    capacity = _vmem_capacity_bytes()
    # ~100 MiB usable on 128 MiB chips (v5e/v6e), ~48 MiB on v7x (64 MiB/TC).
    usable = min(max(capacity - (16 << 20), 32 << 20), 100 << 20)
    tm_max = 1024 if capacity >= (96 << 20) else 512

    bytes_params = sum(int(w.size) * w.dtype.itemsize +
                       int(b.size) * b.dtype.itemsize
                       for (w, b) in padded_params)
    max_n = max(w.shape[1] for (w, _) in padded_params)

    # Balanced row tile, and at least `min_tiles` tiles so both v7x TCs work.
    n_tiles = max(min_tiles, pl.cdiv(M, tm_max))
    TM = max(_round_up(pl.cdiv(M, n_tiles), _SUBLANE), _SUBLANE)

    def budget(tm_):
        tiles = 2 * (tm_ * K + tm_ * n_last) * 4          # double-buffered x/out (f32)
        inter = 2 * tm_ * max_n * 4                        # dot output + post-ReLU h live
        return bytes_params + tiles + inter + (2 << 20)    # small headroom

    # Shrink the row tile first (keeps the fused, resident-weights kernel).
    while TM > _SUBLANE and budget(TM) > usable:
        TM = max(_round_up(TM // 2, _SUBLANE), _SUBLANE)

    if budget(TM) <= usable:
        vmem_limit = min(max(budget(TM), 16 << 20), usable)
        return _fused_resident_mlp(x, padded_params, TM=TM, vmem_limit=vmem_limit)

    # Weights alone do not fit resident (earliest on v7x): stream per layer.
    h = x
    for i, (w, b) in enumerate(padded_params):
        h = _streamed_linear(h, w, b, relu=(i < num_layers - 1))
    return h


class MLP:
    """Pallas port of the PyTorch MLP: (Linear -> ReLU) x (L-1) -> Linear."""

    def __init__(self, input_dim, hidden_dim, output_dim, num_layers, key):
        self.num_layers = num_layers
        self.input_dim = input_dim
        self.output_dim = output_dim
        h = [hidden_dim] * (num_layers - 1)
        in_dims = [input_dim] + h
        out_dims = h + [output_dim]

        # Raw f32 parameters, torch-default-like uniform init.
        self.params = []
        for n, k in zip(in_dims, out_dims):
            key, wk, bk = jax.random.split(key, 3)
            bound = 1.0 / (n ** 0.5)
            w = jax.random.uniform(wk, (n, k), jnp.float32, -bound, bound)
            b = jax.random.uniform(bk, (k,), jnp.float32, -bound, bound)
            self.params.append((w, b))

        # Pad only *internal* hidden dims to 128 multiples; keep the true
        # input_dim / output_dim so x / y carry no zero-pad HBM traffic.
        # Weights stored in bf16 (MXU-native); biases stay f32.
        # TODO(synk): int8 weights are a further option on v5e/v6e only
        # (v7x MXU is fp8-only); keep bf16 for a generation-portable kernel.
        self.padded_params = []
        for li, (w, b) in enumerate(self.params):
            kin, nout = w.shape
            kp = kin if li == 0 else _round_up(kin, _LANE)
            np_ = nout if li == num_layers - 1 else _round_up(nout, _LANE)
            wp = (jnp.zeros((kp, np_), jnp.float32)
                  .at[:kin, :nout].set(w).astype(jnp.bfloat16))
            bp = jnp.zeros((1, np_), jnp.float32).at[0, :nout].set(b)
            self.padded_params.append((wp, bp))

    def __call__(self, x):
        lead = x.shape[:-1]
        h2 = x.reshape(-1, x.shape[-1])
        y = mlp_forward(h2, self.padded_params)
        return y.reshape(*lead, self.output_dim)


def _reference_mlp(x, params, num_layers):
    h = x
    for i, (w, b) in enumerate(params):
        h = h @ w + b
        if i < num_layers - 1:
            h = jnp.maximum(h, 0.0)
    return h


if __name__ == "__main__":
    key = jax.random.PRNGKey(0)
    key, xk, pk = jax.random.split(key, 3)

    batch, seq, input_dim, hidden_dim, output_dim, num_layers = 2, 8, 32, 32, 8, 3
    x = jax.random.normal(xk, (batch, seq, input_dim), jnp.float32)

    mlp = MLP(input_dim, hidden_dim, output_dim, num_layers, pk)

    out = jax.block_until_ready(mlp(x))

    ref = _reference_mlp(x, mlp.params, num_layers)
    assert out.shape == (batch, seq, output_dim), out.shape
    # bf16 matmuls (f32 accumulation) -> loosened tolerance vs f32 reference.
    assert jnp.allclose(out, ref, atol=5e-2, rtol=5e-2), "mismatch vs reference"

    print("KERNEL_OK")
</pallas_src>

<mosaic_0001>
module attributes {stable_mosaic.version = 11 : i64} {
  func.func @_fused_mlp_kernel(%arg0: i32, %arg1: memref<8x32xf32, #tpu.memory_space<vmem>>, %arg2: memref<32x128xbf16, #tpu.memory_space<vmem>>, %arg3: memref<1x128xf32, #tpu.memory_space<vmem>>, %arg4: memref<128x128xbf16, #tpu.memory_space<vmem>>, %arg5: memref<1x128xf32, #tpu.memory_space<vmem>>, %arg6: memref<128x8xbf16, #tpu.memory_space<vmem>>, %arg7: memref<1x8xf32, #tpu.memory_space<vmem>>, %arg8: memref<8x8xf32, #tpu.memory_space<vmem>>) attributes {dimension_semantics = [#tpu.dimension_semantics<parallel>], iteration_bounds = array<i64: 2>, scalar_prefetch = 0 : i64, scratch_operands = 0 : i64, tpu.core_type = #tpu.core_type<tc>, window_params = [{transform_indices = @transform_0, window_bounds = array<i64: 8, 32>}, {pipeline_mode = #tpu.pipeline_mode<synchronous>, transform_indices = @transform_1, window_bounds = array<i64: 32, 128>}, {pipeline_mode = #tpu.pipeline_mode<synchronous>, transform_indices = @transform_2, window_bounds = array<i64: 1, 128>}, {pipeline_mode = #tpu.pipeline_mode<synchronous>, transform_indices = @transform_3, window_bounds = array<i64: 128, 128>}, {pipeline_mode = #tpu.pipeline_mode<synchronous>, transform_indices = @transform_4, window_bounds = array<i64: 1, 128>}, {pipeline_mode = #tpu.pipeline_mode<synchronous>, transform_indices = @transform_5, window_bounds = array<i64: 128, 8>}, {pipeline_mode = #tpu.pipeline_mode<synchronous>, transform_indices = @transform_6, window_bounds = array<i64: 1, 8>}, {transform_indices = @transform_7, window_bounds = array<i64: 8, 8>}]} {
    %c0 = arith.constant 0 : index
    %c0_0 = arith.constant 0 : index
    %0 = vector.load %arg1[%c0, %c0_0] : memref<8x32xf32, #tpu.memory_space<vmem>>, vector<8x32xf32>
    %c0_1 = arith.constant 0 : index
    %c0_2 = arith.constant 0 : index
    %1 = vector.load %arg2[%c0_1, %c0_2] : memref<32x128xbf16, #tpu.memory_space<vmem>>, vector<32x128xbf16>
    %c0_3 = arith.constant 0 : index
    %c0_4 = arith.constant 0 : index
    %2 = vector.load %arg3[%c0_3, %c0_4] : memref<1x128xf32, #tpu.memory_space<vmem>>, vector<1x128xf32>
    %3 = arith.truncf %0 : vector<8x32xf32> to vector<8x32xbf16>
    %cst = arith.constant dense<0.000000e+00> : vector<8x128xf32>
    %4 = tpu.matmul %3, %1, %cst {dimension_numbers = #tpu.dot_dimension_numbers<[1], [0], [0], [1], [0, 0, 1, 1], [], []>} : vector<8x32xbf16>, vector<32x128xbf16>, vector<8x128xf32> -> vector<8x128xf32>
    %5 = vector.broadcast %2 : vector<1x128xf32> to vector<8x128xf32>
    %6 = arith.addf %4, %5 : vector<8x128xf32>
    %cst_5 = arith.constant 0.000000e+00 : f32
    %7 = vector.broadcast %cst_5 : f32 to vector<8x128xf32>
    %8 = arith.maximumf %6, %7 : vector<8x128xf32>
    %c0_6 = arith.constant 0 : index
    %c0_7 = arith.constant 0 : index
    %9 = vector.load %arg4[%c0_6, %c0_7] : memref<128x128xbf16, #tpu.memory_space<vmem>>, vector<128x128xbf16>
    %c0_8 = arith.constant 0 : index
    %c0_9 = arith.constant 0 : index
    %10 = vector.load %arg5[%c0_8, %c0_9] : memref<1x128xf32, #tpu.memory_space<vmem>>, vector<1x128xf32>
    %11 = arith.truncf %8 : vector<8x128xf32> to vector<8x128xbf16>
    %cst_10 = arith.constant dense<0.000000e+00> : vector<8x128xf32>
    %12 = tpu.matmul %11, %9, %cst_10 {dimension_numbers = #tpu.dot_dimension_numbers<[1], [0], [0], [1], [0, 0, 1, 1], [], []>} : vector<8x128xbf16>, vector<128x128xbf16>, vector<8x128xf32> -> vector<8x128xf32>
    %13 = vector.broadcast %10 : vector<1x128xf32> to vector<8x128xf32>
    %14 = arith.addf %12, %13 : vector<8x128xf32>
    %cst_11 = arith.constant 0.000000e+00 : f32
    %15 = vector.broadcast %cst_11 : f32 to vector<8x128xf32>
    %16 = arith.maximumf %14, %15 : vector<8x128xf32>
    %c0_12 = arith.constant 0 : index
    %c0_13 = arith.constant 0 : index
    %17 = vector.load %arg6[%c0_12, %c0_13] : memref<128x8xbf16, #tpu.memory_space<vmem>>, vector<128x8xbf16>
    %c0_14 = arith.constant 0 : index
    %c0_15 = arith.constant 0 : index
    %18 = vector.load %arg7[%c0_14, %c0_15] : memref<1x8xf32, #tpu.memory_space<vmem>>, vector<1x8xf32>
    %19 = arith.truncf %16 : vector<8x128xf32> to vector<8x128xbf16>
    %cst_16 = arith.constant dense<0.000000e+00> : vector<8x8xf32>
    %20 = tpu.matmul %19, %17, %cst_16 {dimension_numbers = #tpu.dot_dimension_numbers<[1], [0], [0], [1], [0, 0, 1, 1], [], []>} : vector<8x128xbf16>, vector<128x8xbf16>, vector<8x8xf32> -> vector<8x8xf32>
    %21 = vector.broadcast %18 : vector<1x8xf32> to vector<8x8xf32>
    %22 = arith.addf %20, %21 : vector<8x8xf32>
    %c0_17 = arith.constant 0 : index
    %c0_18 = arith.constant 0 : index
    %23 = vector.load %arg8[%c0_17, %c0_18] : memref<8x8xf32, #tpu.memory_space<vmem>>, vector<8x8xf32>
    tpu.vector_store %arg8[%c0_17, %c0_18], %22 {strides = array<i32>} : memref<8x8xf32, #tpu.memory_space<vmem>>, vector<8x8xf32>,
    return
  }
  func.func @transform_0(%arg0: i32) -> (i32, i32) {
    %c0_i32 = arith.constant 0 : i32
    %c0_i32_0 = arith.constant 0 : i32
    return %arg0, %c0_i32 : i32, i32
  }
  func.func @transform_1(%arg0: i32) -> (i32, i32) {
    %c0_i32 = arith.constant 0 : i32
    %c0_i32_0 = arith.constant 0 : i32
    %c0_i32_1 = arith.constant 0 : i32
    return %c0_i32, %c0_i32_0 : i32, i32
  }
  func.func @transform_2(%arg0: i32) -> (i32, i32) {
    %c0_i32 = arith.constant 0 : i32
    %c0_i32_0 = arith.constant 0 : i32
    %c0_i32_1 = arith.constant 0 : i32
    return %c0_i32, %c0_i32_0 : i32, i32
  }
  func.func @transform_3(%arg0: i32) -> (i32, i32) {
    %c0_i32 = arith.constant 0 : i32
    %c0_i32_0 = arith.constant 0 : i32
    %c0_i32_1 = arith.constant 0 : i32
    return %c0_i32, %c0_i32_0 : i32, i32
  }
  func.func @transform_4(%arg0: i32) -> (i32, i32) {
    %c0_i32 = arith.constant 0 : i32
    %c0_i32_0 = arith.constant 0 : i32
    %c0_i32_1 = arith.constant 0 : i32
    return %c0_i32, %c0_i32_0 : i32, i32
  }
  func.func @transform_5(%arg0: i32) -> (i32, i32) {
    %c0_i32 = arith.constant 0 : i32
    %c0_i32_0 = arith.constant 0 : i32
    %c0_i32_1 = arith.constant 0 : i32
    return %c0_i32, %c0_i32_0 : i32, i32
  }
  func.func @transform_6(%arg0: i32) -> (i32, i32) {
    %c0_i32 = arith.constant 0 : i32
    %c0_i32_0 = arith.constant 0 : i32
    %c0_i32_1 = arith.constant 0 : i32
    return %c0_i32, %c0_i32_0 : i32, i32
  }
  func.func @transform_7(%arg0: i32) -> (i32, i32) {
    %c0_i32 = arith.constant 0 : i32
    %c0_i32_0 = arith.constant 0 : i32
    return %arg0, %c0_i32 : i32, i32
  }
}

</mosaic_0001>

<bundles_post_ra>
// kernel: tpu_custom_call.1
= control target key start
LH: loop header
LB: loop body
LE: loop exit
PB: predicated region body
PF: predicated region fallthrough
CT: control target
= control target key end

     0   :  { %12 = vsyncpa [#allocation3], 0  ;;  %s1057_s0 = inlined_call_operand.hbm [shape: f32[16,32], index: 0, kind: input, shape index: {}]   ;;  %s1058_s1 = inlined_call_operand.hbm [shape: bf16[32,128], index: 1, kind: input, shape index: {}]   ;;  %s1059_s2 = inlined_call_operand.vmem [shape: f32[1,128], index: 2, kind: input, shape index: {}]   ;;  %s1060_s3 = inlined_call_operand.vmem [shape: bf16[128,128], index: 3, kind: input, shape index: {}]   ;;  %s1061_s4 = inlined_call_operand.vmem [shape: f32[1,128], index: 4, kind: input, shape index: {}]   ;;  %s1062_s5 = inlined_call_operand.vmem [shape: bf16[128,8], index: 5, kind: input, shape index: {}]   ;;  %s1063_s6 = inlined_call_operand.vmem [shape: f32[1,8], index: 6, kind: input, shape index: {}]   ;;  %s1064_s7 = inlined_call_operand.vmem [shape: f32[16,8], index: 7, kind: output, shape index: {}]  }
   0x1   :  { %14 = vsyncpa [#allocation3 + $0x1], 0 }
   0x2   :  { %15 = vsyncpa [#allocation5], 0  ;;  %s897_s24 = smov 0   ;;  %s899_s25 = smov 0  }
   0x3   :  { %s901_s26 = smov 0   ;;  %s903_s27 = smov 0  }
   0x4 LB: > { %s215_s30 = sshll.u32 %s1058_s1, 4  ;;  %s919_s8 = sadd.s32 4294967295, %s852_s27   ;;  %s852_s27 = sphi %s903_s27, %s1071_s27   ;;  %s848_s26 = sphi %s901_s26, %s1070_s26   ;;  %s844_s25 = sphi %s899_s25, %s1069_s25   ;;  %s840_s24 = sphi %s897_s24, %s1068_s24   ;;  %s216_s30 = int_to_ptr.hbm [resolvable:$true] %s215_s30 }
   0x5   : > { %p597_p0 = scmp.ge.s32.totalorder %s852_s27, 1  ;;  %p42_p1 = scmp.eq.s32.totalorder %s919_s8, 0 }
   0x6   : > { %p204_p2 = scmp.lt.s32.totalorder %s852_s27, 3  ;;  %s854_s10 = smov [#allocation4]  }
   0x7   : > { %s217_s11 = sshll.u32 %s854_s10, 4  ;;  %s855_s12 = smov 64   ;;  %s218_s11 = int_to_ptr.vmem [resolvable:$true] %s217_s11 }
   0x8   : > { %p924_p3 = pnand %p597_p0, %p204_p2  ;;  %s856_s13 = smov 4  }
   0x9   : > { %s933_s14 = sadd.s32 1, %s852_s27   ;;  %s28_s16 = sadd.s32 1, %s848_s26 }
   0xa   : > { %p705_p4 = pneg %p924_p3  ;;  %s25_s15 = ssub.s32 %s852_s27, %s933_s14 }
   0xb   : > { %p26_p6 = scmp.eq.s32.totalorder %s25_s15, 0  ;;  %p35_p7 = scmp.ne.s32.totalorder %s848_s26, %s844_s25 }
   0xc   : > { %p706_p5 = pnand %p705_p4, %p42_p1  ;;  %p36_p8 = scmp.eq.s32.totalorder %s852_s27, 0 }
   0xd   : > { %p41_p9 = scmp.ne.s32.totalorder %s844_s25, %s840_s24  ;;  %p714_p12 = scmp.lt.s32.totalorder %s852_s27, 2 }
   0xe   : > { %708 = dma.hbm_to_vmem [thread:$0]  (!%p706_p5), %s216_s30, 256, %s218_s11, [#allocation5], %s855_s12, %s855_s12, %s856_s13  }
   0xf   : > { %s943_s17 = scalar_select %p26_p6, %s848_s26, %s28_s16  }
  0x10   : > { %p37_p10 = por %p36_p8, %p35_p7  ;;  %p947_p11 = por %p42_p1, %p41_p9 }
  0x11   : > { %s246_s19 = sand.u32 1, %s848_s26   ;;  %s601_s21 = sshll.u32 %s852_s27, 3 }
  0x12   : > { %s600_s20 = sshll.u32 %s246_s19, 3  ;;  %s254_s28 = scalar_lea.hbm %s1057_s0, %s601_s21 }
  0x13   : > { %s250_s29 = scalar_lea.vmem [#allocation2], %s600_s20  ;;  %s256_s10 = sshll.u32 %s254_s28, 4  ;;  %s257_s10 = int_to_ptr.hbm [resolvable:$true] %s256_s10 }
  0x14   : > { %s258_s30 = sshll.u32 %s250_s29, 4  ;;  %p957_p13 = pnand %p714_p12, %p37_p10  ;;  %s259_s30 = int_to_ptr.vmem [resolvable:$true] %s258_s30 }
  0x15   : > { %s247_s11 = scalar_lea.sflag [#allocation3], %s246_s19  ;;  %s784_s12 = sshra.s32 %s257_s10, 4  ;;  %s785_s12 = int_to_ptr.hbm [resolvable:$true] %s784_s12 }
  0x16   : > { %s786_s13 = scalar_lea.hbm %s785_s12, 8  ;;  %p788_p2 = pneg %p957_p13 }
  0x17   : > { %p787_p0 = scmp.ne.s32.totalorder %s785_s12, %s786_s13  ;;  %s791_s16 = scalar_lea.hbm %s1057_s0, 16 }
  0x18   : > { %p792_p6 = scmp.lt.s32.totalorder %s785_s12, %s1057_s0  ;;  %p793_p7 = scmp.lt.s32.totalorder %s791_s16, %s786_s13 }
  0x19   : > { %p789_p4 = pnand %p788_p2, %p787_p0 }
  0x1a   : > { %p794_p8 = por %p793_p7, %p792_p6 }
  0x1b   : > { %p790_p5 = pneg %p789_p4 }
  0x1d   : > { %p795_p9 = pnand %p794_p8, %p790_p5 }
  0x1f   : > { %798 = shalt.err (!%p795_p9)
}
  0x20   : > { %712 = dma.hbm_to_vmem [thread:$0]  (!%p957_p13), %s257_s10, 128, %s259_s30, %s247_s11  }
  0x21   : > { %267 = sbr.rel (%p924_p3) target bundleno = 453 (0x1c5), region = 48  ;;  %s269_s19 = sand.u32 (!%p924_p3), 1, %s844_s25  }
  0x22   : > { %s603_s22 = sshll.u32 (!%p924_p3), %s269_s19, 3  ;;  %s270_s23 = scalar_lea.sflag (!%p924_p3), [#allocation3], %s269_s19 }
  0x23   : > { %s273_s28 = scalar_lea.vmem (!%p924_p3), [#allocation2], %s603_s22 }
  0x26   : > { %831 = dma.done.wait (%p947_p11), %s270_s23, 128  }
  0x27   : > { %833 = vsyncadd (%p947_p11), %s270_s23, 4294967168 }
  0x28   : > { %835 = dma.done.wait (%p42_p1), [#allocation5], 256  }
  0x29   : > { %837 = vsyncadd (%p42_p1), [#allocation5], 4294967040  ;;  %v682_v0 = vld [vmem:[#allocation4 + $0x8] sm:$0xff]  ;;  %v681_v2 = vld [vmem:[#allocation4] sm:$0xff]  ;;  %vm336_vm0 = vcmask 261120   ;;  %p309_p1 = scmp.lt.s32.totalorder %s919_s8, 1 }
  0x2a   : > { %v690_v1 = vld [vmem:[%s1060_s3 + $0x38] sm:$0xff]  ;;  %346 = vmatpush.bf16.msra.mxu0 %v682_v0  ;;  %v314_v3 = vld [vmem:[%s273_s28] sm:$0xff]  ;;  %v689_v4 = vld [vmem:[%s1060_s3 + $0x30] sm:$0xff]  ;;  %vm519_vm1 = vcmask 64512  }
  0x2b   : > { %423 = vmatpush.bf16.msra.mxu1 %v690_v1  ;;  %v320_v5 = vpack.c.bf16 %v314_v3, %v314_v3  ;;  %v688_v6 = vld [vmem:[%s1060_s3 + $0x28] sm:$0xff]  ;;  %v687_v7 = vld [vmem:[%s1060_s3 + $0x20] sm:$0xff]  ;;  %v686_v8 = vld [vmem:[%s1060_s3 + $0x18] sm:$0xff]  ;;  %s1073_s8 = smov (!%p309_p1, %s919_s8), 1 }
  0x2c   : > { %v685_v9 = vld [vmem:[%s1060_s3 + $0x10] sm:$0xff]  ;;  %v684_v10 = vld [vmem:[%s1060_s3 + $0x8] sm:$0xff]  ;;  %v683_v11 = vld [vmem:[%s1060_s3] sm:$0xff]  ;;  %s605_s9 = sshll.u32 %s1073_s8, 3 }
  0x2d   : > { %v698_v12 = vld [vmem:[%s1062_s5 + $0x38] sm:$0xff]  ;;  %v697_v13 = vld [vmem:[%s1062_s5 + $0x30] sm:$0xff]  ;;  %v696_v14 = vld [vmem:[%s1062_s5 + $0x28] sm:$0xff]  ;;  %s312_s24 = scalar_lea.vmem %s1064_s7, %s605_s9 }
  0x2e   : > { %347 = vmatpush.bf16.msra.mxu0 %v681_v2  ;;  %506 = vmatpush.bf16.msra.mxu2 %v698_v12  ;;  %v695_v15 = vld [vmem:[%s1062_s5 + $0x20] sm:$0xff]  ;;  %v694_v16 = vld [vmem:[%s1062_s5 + $0x18] sm:$0xff]  ;;  %v693_v17 = vld [vmem:[%s1062_s5 + $0x10] sm:$0xff] }
  0x2f   : > { %424 = vmatpush.bf16.msra.mxu1 %v689_v4  ;;  %v751_v18 = vld [vmem:[%s1059_s2] ss:$0 sm:$0xff]  ;;  %v692_v24 = vld [vmem:[%s1062_s5 + $0x8] sm:$0xff] }
  0x30   : > { %v691_v25 = vld [vmem:[%s1062_s5] sm:$0xff] }
  0x31   : > { %614 = vmatmul.msk.bf16.vlgmr.msra.gmra.mxu0 %vm336_vm0, %v320_v5  ;;  %v752_v26 = vld [vmem:[%s1061_s4] ss:$0 sm:$0xff] }
  0x32   : > { %507 = vmatpush.bf16.msra.mxu2 %v697_v13  ;;  %v753_v32 = vld [vmem:[%s1063_s6] ss:$0 sm:$0xff] }
  0x33   : > { %425 = vmatpush.bf16.msra.mxu1 %v688_v6 }
  0x36   : > { %508 = vmatpush.bf16.msra.mxu2 %v696_v14 }
  0x37   : > { %426 = vmatpush.bf16.msra.mxu1 %v687_v7 }
  0x3a   : > { %509 = vmatpush.bf16.msra.mxu2 %v695_v15 }
  0x3b   : > { %427 = vmatpush.bf16.msra.mxu1 %v686_v8 }
  0x3e   : > { %510 = vmatpush.bf16.msra.mxu2 %v694_v16 }
  0x3f   : > { %428 = vmatpush.bf16.msra.mxu1 %v685_v9 }
  0x42   : > { %511 = vmatpush.bf16.msra.mxu2 %v693_v17 }
  0x43   : > { %429 = vmatpush.bf16.msra.mxu1 %v684_v10 }
  0x46   : > { %512 = vmatpush.bf16.msra.mxu2 %v692_v24 }
  0x47   : > { %430 = vmatpush.bf16.msra.mxu1 %v683_v11 }
  0x4a   : > { %513 = vmatpush.bf16.msra.mxu2 %v691_v25 }
  0xae   : > { %v349_v19 = vpop.f32.mrf.mxu0 }
  0xaf   : > { %v350_v20 = vadd.f32 %v751_v18, %v349_v19 }
  0xb1   : > { %v353_v21 = vmax.f32 %v350_v20, 0.0 }
  0xb3   : > { %v371_v22 = vpack.c.bf16 %v353_v21, %v353_v21 }
  0xb5   : > { %431 = vmatmul.bf16.vlgmr.msra.gmra.mxu1 %v371_v22 }
  0xb6   : > { %v351_v23 = vpop.f32.mrf.mxu0 }
 0x132   : > { %v432_v27 = vpop.f32.mrf.mxu1 }
 0x133   : > { %v433_v28 = vadd.f32 %v752_v26, %v432_v27 }
 0x135   : > { %v436_v29 = vmax.f32 %v433_v28, 0.0 }
 0x137   : > { %v454_v30 = vpack.c.bf16 %v436_v29, %v436_v29 }
 0x139   : > { %514 = vmatmul.bf16.vlgmr.msra.gmra.mxu2 %v454_v30 }
 0x13a   : > { %v434_v31 = vpop.f32.mrf.mxu1 }
 0x1bc   : > { %v515_v33 = vpop.f32.mrf.mxu2 }
 0x1bd   : > { %v516_v34 = vadd.f32 %v753_v32, %v515_v33 }
 0x1bf   : > { %520 = vst.msk [vmem:[%s312_s24] sm:$0xff] %vm519_vm1, %v516_v34 }
 0x1c4   : > { %v517_v35 = vpop.f32.mrf.mxu2 }
 0x1c5 PF: > { %p18_p3 = scmp.ge.s32.totalorder %s933_s14, 4   ;;  %s1068_s24 = smov %s844_s25 }
 0x1c6   : > { %s1069_s25 = smov %s848_s26  ;;  %s1070_s26 = smov %s943_s17 }
 0x1c7   : > { %s1071_s27 = smov %s933_s14  ;;  %20 = sbr.rel (!%p18_p3) target bundleno = 4 (0x4), region = 92 }
 0x1cc   :  { %540 = vsyncpa [#allocation3], 1 }
 0x1cd   :  { %542 = vsyncpa [#allocation3 + $0x1], 1 }
 0x1ce   :  { %543 = vsyncpa [#allocation5], 1 }

</bundles_post_ra>
